<compile_context>
chip_gen: v7x
topology: tpu7x:2x2x1
jax: 0.10.0
libtpu: 0.0.40
codegen_flags: <defaults>
</compile_context>

<pallas_src>
import numpy as np
import jax
import jax.numpy as jnp
from jax import lax
from jax.experimental import pallas as pl
from jax.experimental.pallas import tpu as pltpu


def _round_up(n: int, m: int) -> int:
    return ((n + m - 1) // m) * m


def make_action_decoder_kernel(*, num_hidden_layers: int, action_size: int,
                               d_pad: int, h_pad: int, o_pad: int,
                               min_std: float, init_std: float,
                               mean_scale: float):
    """Kernel closing over all static hyper-parameters / padded dims."""
    raw_init_std = float(np.log(np.exp(init_std) - 1.0))
    inv_mean_scale = 1.0 / float(mean_scale)
    mean_scale = float(mean_scale)
    min_std = float(min_std)

    def _softplus(x):
        # numerically stable softplus, lowers to VPU/EUP ops only
        return jnp.maximum(x, 0.0) + jnp.log1p(jnp.exp(-jnp.abs(x)))

    def kernel(x_ref, w_ref, b_ref, o_ref):
        # x_ref : (TB, d_pad)          -- one batch tile
        # w_ref : (total_rows, w_max)  -- packed weights, VMEM-resident
        # b_ref : (num_layers+1, w_max)
        # o_ref : (TB, o_pad)          -- lane-dense output slab
        h = x_ref[...]

        # Hidden Linear + ReLU stack (static, 128-aligned row offsets into the
        # weight slab -> plain tile-aligned VMEM loads, MXU matmuls).
        row = 0
        in_dim = d_pad
        for li in range(num_hidden_layers):
            w = w_ref[row:row + in_dim, :h_pad]
            b = b_ref[li:li + 1, :h_pad]
            h = jnp.dot(h, w, preferred_element_type=jnp.float32) + b
            h = jnp.maximum(h, 0.0)
            row += in_dim
            in_dim = h_pad

        # Final Linear -> 2 * action_size (padded to o_pad lanes).
        w = w_ref[row:row + in_dim, :o_pad]
        b = b_ref[num_hidden_layers:num_hidden_layers + 1, :o_pad]
        out = jnp.dot(h, w, preferred_element_type=jnp.float32) + b

        # chunk + squash via a column mask (no sub-lane slicing):
        #   cols [0, A)      -> mean = mean_scale * tanh(out / mean_scale)
        #   cols [A, 2A)     -> std  = softplus(out + raw_init_std) + min_std
        #   cols [2A, o_pad) -> padding, sliced off in the wrapper
        col = lax.broadcasted_iota(jnp.int32, out.shape, 1)
        mean_part = mean_scale * jnp.tanh(out * inv_mean_scale)
        std_part = _softplus(out + raw_init_std) + min_std
        o_ref[...] = jnp.where(col < action_size, mean_part,
                               std_part).astype(o_ref.dtype)

    return kernel


def pack_params(params, input_size, units, action_size):
    """Zero-pad and concatenate all layer weights/biases into two slabs."""
    num_hidden_layers = len(params) - 1
    d_pad = _round_up(input_size, 128)
    h_pad = _round_up(max(units, 1), 128)
    o_pad = _round_up(2 * action_size, 128)
    w_max = max(h_pad, o_pad)

    w_blocks, b_rows = [], []
    for li, (w, b) in enumerate(params):
        in_d, out_d = w.shape
        in_pad = d_pad if li == 0 else h_pad
        wb = jnp.zeros((in_pad, w_max), jnp.float32)
        wb = wb.at[:in_d, :out_d].set(w.astype(jnp.float32))
        bb = jnp.zeros((1, w_max), jnp.float32)
        bb = bb.at[0, :out_d].set(b.reshape(-1).astype(jnp.float32))
        w_blocks.append(wb)
        b_rows.append(bb)

    w_slab = jnp.concatenate(w_blocks, axis=0)
    b_slab = jnp.concatenate(b_rows, axis=0)
    return w_slab, b_slab, d_pad, h_pad, o_pad, w_max, num_hidden_layers


def action_decoder_forward(x, params, *, action_size, min_std=1e-4,
                           init_std=5.0, mean_scale=5.0, block_b=32):
    """params: list of (W, b) tuples, hidden layers first, final layer last.

    Batch many rollout timesteps/envs into x so the (tiny) weight slabs are
    loaded into VMEM once and reused across all grid steps.
    """
    B, input_size = x.shape
    units = params[0][0].shape[1] if len(params) > 1 else input_size

    (w_slab, b_slab, d_pad, h_pad, o_pad, w_max,
     num_hidden_layers) = pack_params(params, input_size, units, action_size)

    # Batch tile: multiple of 8 sublanes; pad B up to a whole number of tiles.
    block_b = max(8, min(int(block_b), _round_up(B, 8)))
    b_pad = _round_up(B, block_b)
    x_pad = jnp.zeros((b_pad, d_pad), jnp.float32)
    x_pad = x_pad.at[:B, :input_size].set(x.astype(jnp.float32))

    kernel = make_action_decoder_kernel(
        num_hidden_layers=num_hidden_layers, action_size=action_size,
        d_pad=d_pad, h_pad=h_pad, o_pad=o_pad,
        min_std=min_std, init_std=init_std, mean_scale=mean_scale)

    total_rows = w_slab.shape[0]
    n_bias = b_slab.shape[0]
    grid = (b_pad // block_b,)

    out = pl.pallas_call(
        kernel,
        out_shape=jax.ShapeDtypeStruct((b_pad, o_pad), jnp.float32),
        grid_spec=pltpu.PrefetchScalarGridSpec(
            num_scalar_prefetch=0,
            grid=grid,
            in_specs=[
                # batch tile marches over the grid
                pl.BlockSpec((block_b, d_pad), lambda i: (i, 0)),
                # weight/bias slabs: constant block index -> resident in VMEM
                pl.BlockSpec((total_rows, w_max), lambda i: (0, 0)),
                pl.BlockSpec((n_bias, w_max), lambda i: (0, 0)),
            ],
            out_specs=pl.BlockSpec((block_b, o_pad), lambda i: (i, 0)),
        ),
        compiler_params=pltpu.CompilerParams(
            dimension_semantics=("parallel",)),
    )(x_pad, w_slab, b_slab)

    out = out[:B, :2 * action_size]
    return out[:, :action_size], out[:, action_size:]


def init_params(key, input_size, action_size, layers, units):
    """Deterministic init mimicking nn.Linear default (uniform +- 1/sqrt(fan_in))."""
    params = []
    cur = input_size
    sizes = [units] * layers + [2 * action_size]
    for out in sizes:
        key, kw, kb = jax.random.split(key, 3)
        bound = 1.0 / np.sqrt(cur)
        w = jax.random.uniform(kw, (cur, out), jnp.float32, -bound, bound)
        b = jax.random.uniform(kb, (out,), jnp.float32, -bound, bound)
        params.append((w, b))
        cur = out
    return params


def reference_forward(x, params, *, action_size, min_std=1e-4,
                      init_std=5.0, mean_scale=5.0):
    """Pure-JAX reference for a sanity check."""
    raw_init_std = float(np.log(np.exp(init_std) - 1.0))
    h = x
    for (w, b) in params[:-1]:
        h = jnp.maximum(h @ w + b, 0.0)
    w, b = params[-1]
    out = h @ w + b
    mean_raw, std_raw = out[:, :action_size], out[:, action_size:]
    mean = mean_scale * jnp.tanh(mean_raw / mean_scale)
    std = jax.nn.softplus(std_raw + raw_init_std) + min_std
    return mean, std


if __name__ == "__main__":
    # Small, module-consistent shapes; batch = many rollout steps folded into
    # one call so the kernel is not pure launch overhead.
    B = 64           # batched env/timesteps
    input_size = 32  # deterministic + stochastic state size
    units = 32
    layers = 2
    action_size = 8

    key = jax.random.PRNGKey(0)
    key, kx = jax.random.split(key)
    x = jax.random.normal(kx, (B, input_size), jnp.float32)

    params = init_params(key, input_size, action_size, layers, units)

    mean, std = action_decoder_forward(x, params, action_size=action_size)
    mean = jax.block_until_ready(mean)
    std = jax.block_until_ready(std)

    mean_ref, std_ref = reference_forward(x, params, action_size=action_size)
    assert np.allclose(np.asarray(mean), np.asarray(mean_ref), atol=1e-5, rtol=1e-5)
    assert np.allclose(np.asarray(std), np.asarray(std_ref), atol=1e-5, rtol=1e-5)
    assert mean.shape == (B, action_size) and std.shape == (B, action_size)
    assert bool(jnp.all(std > 0))

    print("KERNEL_OK")
</pallas_src>

<mosaic_0001>
module attributes {stable_mosaic.version = 11 : i64} {
  func.func @kernel(%arg0: i32, %arg1: memref<32x128xf32, #tpu.memory_space<vmem>>, %arg2: memref<384x128xf32, #tpu.memory_space<vmem>>, %arg3: memref<3x128xf32, #tpu.memory_space<vmem>>, %arg4: memref<32x128xf32, #tpu.memory_space<vmem>>) attributes {dimension_semantics = [#tpu.dimension_semantics<parallel>], iteration_bounds = array<i64: 2>, scalar_prefetch = 0 : i64, scratch_operands = 0 : i64, tpu.core_type = #tpu.core_type<tc>, window_params = [{transform_indices = @transform_0, window_bounds = array<i64: 32, 128>}, {pipeline_mode = #tpu.pipeline_mode<synchronous>, transform_indices = @transform_1, window_bounds = array<i64: 384, 128>}, {pipeline_mode = #tpu.pipeline_mode<synchronous>, transform_indices = @transform_2, window_bounds = array<i64: 3, 128>}, {transform_indices = @transform_3, window_bounds = array<i64: 32, 128>}]} {
    %c0 = arith.constant 0 : index
    %c0_0 = arith.constant 0 : index
    %0 = vector.load %arg1[%c0, %c0_0] : memref<32x128xf32, #tpu.memory_space<vmem>>, vector<32x128xf32>
    %c0_1 = arith.constant 0 : index
    %c0_2 = arith.constant 0 : index
    %1 = vector.load %arg2[%c0_1, %c0_2] : memref<384x128xf32, #tpu.memory_space<vmem>>, vector<128x128xf32>
    %c0_3 = arith.constant 0 : index
    %c0_4 = arith.constant 0 : index
    %2 = vector.load %arg3[%c0_3, %c0_4] : memref<3x128xf32, #tpu.memory_space<vmem>>, vector<1x128xf32>
    %cst = arith.constant dense<0.000000e+00> : vector<32x128xf32>
    %3 = tpu.matmul %0, %1, %cst {dimension_numbers = #tpu.dot_dimension_numbers<[1], [0], [0], [1], [0, 0, 1, 1], [], []>} : vector<32x128xf32>, vector<128x128xf32>, vector<32x128xf32> -> vector<32x128xf32>
    %4 = vector.broadcast %2 : vector<1x128xf32> to vector<32x128xf32>
    %5 = arith.addf %3, %4 : vector<32x128xf32>
    %cst_5 = arith.constant 0.000000e+00 : f32
    %6 = vector.broadcast %cst_5 : f32 to vector<32x128xf32>
    %7 = arith.maximumf %5, %6 : vector<32x128xf32>
    %c128 = arith.constant 128 : index
    %c0_6 = arith.constant 0 : index
    %8 = vector.load %arg2[%c128, %c0_6] : memref<384x128xf32, #tpu.memory_space<vmem>>, vector<128x128xf32>
    %c1 = arith.constant 1 : index
    %c0_7 = arith.constant 0 : index
    %9 = vector.load %arg3[%c1, %c0_7] : memref<3x128xf32, #tpu.memory_space<vmem>>, vector<1x128xf32>
    %cst_8 = arith.constant dense<0.000000e+00> : vector<32x128xf32>
    %10 = tpu.matmul %7, %8, %cst_8 {dimension_numbers = #tpu.dot_dimension_numbers<[1], [0], [0], [1], [0, 0, 1, 1], [], []>} : vector<32x128xf32>, vector<128x128xf32>, vector<32x128xf32> -> vector<32x128xf32>
    %11 = vector.broadcast %9 : vector<1x128xf32> to vector<32x128xf32>
    %12 = arith.addf %10, %11 : vector<32x128xf32>
    %cst_9 = arith.constant 0.000000e+00 : f32
    %13 = vector.broadcast %cst_9 : f32 to vector<32x128xf32>
    %14 = arith.maximumf %12, %13 : vector<32x128xf32>
    %c256 = arith.constant 256 : index
    %c0_10 = arith.constant 0 : index
    %15 = vector.load %arg2[%c256, %c0_10] : memref<384x128xf32, #tpu.memory_space<vmem>>, vector<128x128xf32>
    %c2 = arith.constant 2 : index
    %c0_11 = arith.constant 0 : index
    %16 = vector.load %arg3[%c2, %c0_11] : memref<3x128xf32, #tpu.memory_space<vmem>>, vector<1x128xf32>
    %cst_12 = arith.constant dense<0.000000e+00> : vector<32x128xf32>
    %17 = tpu.matmul %14, %15, %cst_12 {dimension_numbers = #tpu.dot_dimension_numbers<[1], [0], [0], [1], [0, 0, 1, 1], [], []>} : vector<32x128xf32>, vector<128x128xf32>, vector<32x128xf32> -> vector<32x128xf32>
    %18 = vector.broadcast %16 : vector<1x128xf32> to vector<32x128xf32>
    %19 = arith.addf %17, %18 : vector<32x128xf32>
    %20 = tpu.iota {dimensions = array<i32: 1>} : vector<32x128xi32>
    %cst_13 = arith.constant 2.000000e-01 : f32
    %21 = vector.broadcast %cst_13 : f32 to vector<32x128xf32>
    %22 = arith.mulf %19, %21 : vector<32x128xf32>
    %23 = math.tanh %22 : vector<32x128xf32>
    %cst_14 = arith.constant 5.000000e+00 : f32
    %24 = vector.broadcast %cst_14 : f32 to vector<32x128xf32>
    %25 = arith.mulf %24, %23 : vector<32x128xf32>
    %cst_15 = arith.constant 4.9932394 : f32
    %26 = vector.broadcast %cst_15 : f32 to vector<32x128xf32>
    %27 = arith.addf %19, %26 : vector<32x128xf32>
    %cst_16 = arith.constant 0.000000e+00 : f32
    %28 = vector.broadcast %cst_16 : f32 to vector<32x128xf32>
    %29 = arith.maximumf %27, %28 : vector<32x128xf32>
    %30 = math.absf %27 : vector<32x128xf32>
    %cst_17 = arith.constant 0.000000e+00 : f32
    %31 = vector.broadcast %cst_17 : f32 to vector<32x128xf32>
    %32 = arith.subf %31, %30 : vector<32x128xf32>
    %33 = math.exp %32 : vector<32x128xf32>
    %34 = math.log1p %33 : vector<32x128xf32>
    %35 = arith.addf %29, %34 : vector<32x128xf32>
    %cst_18 = arith.constant 9.99999974E-5 : f32
    %36 = vector.broadcast %cst_18 : f32 to vector<32x128xf32>
    %37 = arith.addf %35, %36 : vector<32x128xf32>
    %c8_i32 = arith.constant 8 : i32
    %38 = vector.broadcast %c8_i32 : i32 to vector<32x128xi32>
    %39 = arith.cmpi slt, %20, %38 : vector<32x128xi32>
    %40 = arith.select %39, %25, %37 : vector<32x128xi1>, vector<32x128xf32>
    %c0_19 = arith.constant 0 : index
    %c0_20 = arith.constant 0 : index
    %41 = vector.load %arg4[%c0_19, %c0_20] : memref<32x128xf32, #tpu.memory_space<vmem>>, vector<32x128xf32>
    tpu.vector_store %arg4[%c0_19, %c0_20], %40 {strides = array<i32>} : memref<32x128xf32, #tpu.memory_space<vmem>>, vector<32x128xf32>,
    return
  }
  func.func @transform_0(%arg0: i32) -> (i32, i32) {
    %c0_i32 = arith.constant 0 : i32
    %c0_i32_0 = arith.constant 0 : i32
    return %arg0, %c0_i32 : i32, i32
  }
  func.func @transform_1(%arg0: i32) -> (i32, i32) {
    %c0_i32 = arith.constant 0 : i32
    %c0_i32_0 = arith.constant 0 : i32
    %c0_i32_1 = arith.constant 0 : i32
    return %c0_i32, %c0_i32_0 : i32, i32
  }
  func.func @transform_2(%arg0: i32) -> (i32, i32) {
    %c0_i32 = arith.constant 0 : i32
    %c0_i32_0 = arith.constant 0 : i32
    %c0_i32_1 = arith.constant 0 : i32
    return %c0_i32, %c0_i32_0 : i32, i32
  }
  func.func @transform_3(%arg0: i32) -> (i32, i32) {
    %c0_i32 = arith.constant 0 : i32
    %c0_i32_0 = arith.constant 0 : i32
    return %arg0, %c0_i32 : i32, i32
  }
}

</mosaic_0001>

<bundles_post_ra>
// kernel: tpu_custom_call.1
= control target key start
LH: loop header
LB: loop body
LE: loop exit
PB: predicated region body
PF: predicated region fallthrough
CT: control target
= control target key end

     0   :  { %8 = vsyncpa [#allocation3], 0  ;;  %s1526_s0 = inlined_call_operand.hbm [shape: f32[64,128], index: 0, kind: input, shape index: {}]   ;;  %s1527_s1 = inlined_call_operand.hbm [shape: f32[384,128], index: 1, kind: input, shape index: {}]   ;;  %s1528_s2 = inlined_call_operand.vmem [shape: f32[3,128], index: 2, kind: input, shape index: {}]   ;;  %s1529_s3 = inlined_call_operand.hbm [shape: f32[64,128], index: 3, kind: output, shape index: {}]  }
   0x1   :  { %10 = vsyncpa [#allocation3 + $0x1], 0 }
   0x2   :  { %11 = vsyncpa [#allocation6], 0 }
   0x3   :  { %12 = vsyncpa [#allocation4], 0 }
   0x4   :  { %14 = vsyncpa [#allocation4 + $0x1], 0  ;;  %s1273_s12 = smov 0   ;;  %s1275_s13 = smov 0  }
   0x5   :  { %s1277_s14 = smov 0   ;;  %s1279_s15 = smov 0  }
   0x6 LB: > { %s1294_s16 = sadd.s32 4294967295, %s1244_s15   ;;  %s724_s17 = sadd.s32 4294967294, %s1244_s15   ;;  %s1244_s15 = sphi %s1279_s15, %s1549_s15   ;;  %s1240_s14 = sphi %s1277_s14, %s1548_s14   ;;  %s1236_s13 = sphi %s1275_s13, %s1547_s13   ;;  %s1232_s12 = sphi %s1273_s12, %s1546_s12  }
   0x7   : > { %p40_p0 = scmp.ne.s32.totalorder %s1236_s13, %s1232_s12  ;;  %p1530_p1 = scmp.eq.s32.totalorder %s1294_s16, 0 }
   0x8   : > { %p112_p3 = scmp.eq.s32.totalorder %s724_s17, 1  ;;  %p725_p5 = scmp.ge.s32.totalorder %s1244_s15, 1 }
   0x9   : > { %p1303_p4 = por %p1530_p1, %p40_p0  ;;  %p119_p7 = scmp.lt.s32.totalorder %s1244_s15, 3 }
   0xa   : > { %p1308_p6 = por %p112_p3, %p40_p0  ;;  %s1246_s21 = smov [#allocation5]  }
   0xb   : > { %s1533_s18 = scalar_select %p1303_p4, 1, 0 }
   0xc   : > { %s1534_s19 = scalar_select %p1308_p6, 1, 0 }
   0xd   : > { %p1313_p8 = pnand %p725_p5, %p119_p7  ;;  %s131_s22 = sshll.u32 %s1246_s21, 4  ;;  %s1317_s22 = int_to_ptr.vmem [resolvable:$true] %s131_s22 }
   0xe   : > { %s1329_s24 = sadd.s32 1, %s1244_s15   ;;  %s27_s25 = sadd.s32 1, %s1240_s14 }
   0xf   : > { %s1535_s20 = scalar_select %p1313_p8, 1, 0 }
  0x10   : > { %p1039_p9 = pneg %p1313_p8  ;;  %s24_s26 = ssub.s32 %s1244_s15, %s1329_s24 }
  0x11   : > { %s1116_s29 = scalar_lea.hbm %s1527_s1, 6144 }
  0x12   : > { %p1324_p11 = pnand %p1039_p9, %p1530_p1  ;;  %p1117_p12 = scmp.ne.s32.totalorder %s1527_s1, %s1116_s29 }
  0x13   : > { %p1123_p5 = scmp.lt.u32.totalorder %s1116_s29, %s1527_s1 }
  0x14   : > { %p1118_p13 = pneg %p1324_p11 }
  0x16   : > { %p1119_p0 = pnand %p1118_p13, %p1117_p12 }
  0x18   : > { %p1120_p3 = pneg %p1119_p0 }
  0x1a   : > { %p1125_p7 = pnand %p1123_p5, %p1120_p3 }
  0x1c   : > { %1128 = shalt.err (!%p1125_p7)
}
  0x1d   : > { %s1129_s7 = scalar_lea.vmem %s1317_s22, 6144  ;;  %p1137_p2 = scmp.lt.s32.totalorder %s1317_s22, %s1317_s22 }
  0x1e   : > { %p1130_p9 = scmp.ne.s32.totalorder %s1317_s22, %s1129_s7  ;;  %p1138_p6 = scmp.lt.s32.totalorder %s1129_s7, %s1129_s7 }
  0x20   : > { %p1132_p10 = pnand %p1130_p9, %p1118_p13  ;;  %p1139_p4 = por %p1138_p6, %p1137_p2 }
  0x22   : > { %p1133_p1 = pneg %p1132_p10 }
  0x24   : > { %p1140_p8 = pnand %p1139_p4, %p1133_p1 }
  0x26   : > { %1143 = shalt.err (!%p1140_p8)
}
  0x27   : > { %s1247_s8 = smov 128   ;;  %s1248_s9 = smov 8  }
  0x28   : > { %1042 = dma.hbm_to_vmem [thread:$0]  (!%p1324_p11), %s1527_s1, 6144, %s1317_s22, [#allocation6], %s1247_s8, %s1247_s8, %s1248_s9  }
  0x29   : > { %p25_p1 = scmp.eq.s32.totalorder %s24_s26, 0  ;;  %p34_p2 = scmp.ne.s32.totalorder %s1240_s14, %s1236_s13 }
  0x2a   : > { %p35_p4 = scmp.eq.s32.totalorder %s1244_s15, 0  ;;  %p1052_p6 = scmp.lt.s32.totalorder %s1244_s15, 2 }
  0x2b   : > { %s1363_s17 = scalar_select %p25_p1, %s1240_s14, %s27_s25  }
  0x2c   : > { %p36_p8 = por %p35_p4, %p34_p2  ;;  %p1537_p10 = scmp.eq.s32.totalorder %s1294_s16, 1 }
  0x2d   : > { %s148_s23 = sand.u32 1, %s1240_s14   ;;  %s743_s27 = sshll.u32 %s1244_s15, 9 }
  0x2e   : > { %p1367_p12 = por %p1537_p10, %p34_p2  ;;  %s728_s28 = sshll.u32 %s148_s23, 5 }
  0x2f   : > { %s1376_s4 = scalar_lea.hbm %s1526_s0, %s743_s27  ;;  %s152_s22 = scalar_lea.vmem [#allocation2], %s728_s28 }
  0x30   : > { %s159_s25 = sshll.u32 %s152_s22, 4  ;;  %p1378_p11 = pnand %p1052_p6, %p36_p8  ;;  %s1382_s25 = int_to_ptr.vmem [resolvable:$true] %s159_s25 }
  0x31   : > { %s1384_s5 = scalar_lea.sflag [#allocation3], %s148_s23  ;;  %s1144_s6 = scalar_lea.hbm %s1376_s4, 512 }
  0x32   : > { %p1145_p13 = scmp.ne.s32.totalorder %s1376_s4, %s1144_s6  ;;  %p1146_p0 = pneg %p1378_p11 }
  0x33   : > { %s1149_s11 = scalar_lea.hbm %s1526_s0, 1024  ;;  %p1150_p7 = scmp.lt.u32.totalorder %s1376_s4, %s1526_s0 }
  0x34   : > { %p1147_p3 = pnand %p1146_p0, %p1145_p13  ;;  %p1151_p9 = scmp.lt.u32.totalorder %s1149_s11, %s1144_s6 }
  0x35   : > { %p1153_p2 = scmp.lt.u32.totalorder %s1144_s6, %s1376_s4 }
  0x36   : > { %p1148_p5 = pneg %p1147_p3  ;;  %p1152_p1 = por %p1151_p9, %p1150_p7 }
  0x38   : > { %p1154_p4 = por %p1153_p2, %p1152_p1 }
  0x3a   : > { %p1155_p6 = pnand %p1154_p4, %p1148_p5 }
  0x3c   : > { %1158 = shalt.err (!%p1155_p6)
}
  0x3d   : > { %s1159_s23 = scalar_lea.vmem %s1382_s25, 512  ;;  %s1249_s29 = smov [#allocation2]  }
  0x3e   : > { %p1160_p8 = scmp.ne.s32.totalorder %s1382_s25, %s1159_s23  ;;  %s1164_s30 = sshll.u32 %s1249_s29, 4  ;;  %s1165_s30 = int_to_ptr.vmem [resolvable:$false] %s1164_s30 }
  0x3f   : > { %s1166_s22 = scalar_lea.vmem %s1165_s30, 1024  ;;  %p1167_p3 = scmp.lt.s32.totalorder %s1382_s25, %s1165_s30 }
  0x40   : > { %p1162_p10 = pnand %p1160_p8, %p1146_p0  ;;  %p1168_p7 = scmp.lt.s32.totalorder %s1166_s22, %s1159_s23 }
  0x42   : > { %p1163_p13 = pneg %p1162_p10  ;;  %p1169_p9 = por %p1168_p7, %p1167_p3 }
  0x44   : > { %p1170_p1 = pnand %p1169_p9, %p1163_p13 }
  0x46   : > { %1173 = shalt.err (!%p1170_p1)
}
  0x47   : > { %1046 = dma.hbm_to_vmem [thread:$0]  (!%p1378_p11), %s1376_s4, 512, %s1382_s25, %s1384_s5, %s1247_s8, %s1247_s8, %s1248_s9  }
  0x48   : > { %p1540_p0 = scmp.ne.s32.totalorder %s1535_s20, 0 }
  0x49   : > { %s1418_s6 = sand.u32 (!%p1540_p0), 1, %s1236_s13   ;;  %p1541_p5 = scmp.ne.s32.totalorder (!%p1540_p0), %s1533_s18, 0 }
  0x4a   : > { %171 = sbr.rel (%p1540_p0) target bundleno = 830 (0x33e), region = 32  ;;  %s732_s7 = sshll.u32 (!%p1540_p0), %s1418_s6, 5 }
  0x4b   : > { %s174_s10 = scalar_lea.sflag (!%p1540_p0), [#allocation3], %s1418_s6  ;;  %s1424_s26 = scalar_lea.vmem (!%p1540_p0), [#allocation2], %s732_s7 }
  0x51   : > { %1219 = dma.done.wait (%p1541_p5), %s174_s10, 512  }
  0x52   : > { %1221 = vsyncadd (%p1541_p5), %s174_s10, 4294966784  ;;  %p1542_p11 = scmp.eq.s32.totalorder %s1294_s16, 0 }
  0x54   : > { %1223 = dma.done.wait (%p1542_p11), [#allocation6], 6144   ;;  %p1543_p2 = pmov %p1542_p11 }
  0x55   : > { %v210_v0 = vld [vmem:[#allocation5] sm:$0xff]  ;;  %v211_v1 = vld [vmem:[#allocation5 + $0x8] sm:$0xff]  ;;  %v212_v2 = vld [vmem:[#allocation5 + $0x10] sm:$0xff]  ;;  %s744_s5 = sshll.u32 %s1294_s16, 9  ;;  %s203_s11 = scalar_lea.vmem [#allocation7], %s732_s7 }
  0x56   : > { %1225 = vsyncadd (%p1543_p2), [#allocation6], 4294961152  ;;  %v919_v3 = vpack.c.bf16 %v211_v1, %v210_v0  ;;  %v213_v4 = vld [vmem:[#allocation5 + $0x18] sm:$0xff]  ;;  %v214_v6 = vld [vmem:[#allocation5 + $0x20] sm:$0xff]  ;;  %s641_s27 = sshll.u32 %s203_s11, 4  ;;  %s1476_s29 = scalar_lea.hbm %s1529_s3, %s744_s5  ;;  %s1478_s27 = int_to_ptr.vmem [resolvable:$true] %s641_s27 }
  0x57   : > { %v923_v5 = vpack.c.bf16 %v213_v4, %v212_v2  ;;  %v215_v7 = vld [vmem:[#allocation5 + $0x28] sm:$0xff]  ;;  %v206_v9 = vld [vmem:[%s1424_s26] sm:$0xff]  ;;  %v216_v10 = vld [vmem:[#allocation5 + $0x30] sm:$0xff]  ;;  %s628_s16 = scalar_lea.sflag [#allocation4], %s1418_s6  ;;  %s1174_s30 = scalar_lea.vmem %s1478_s27, 512 }
  0x58   : > { %920 = vmatprep.subr.bf16.mxu0 %v919_v3  ;;  %v927_v8 = vpack.c.bf16 %v215_v7, %v214_v6  ;;  %v217_v11 = vld [vmem:[#allocation5 + $0x38] sm:$0xff]  ;;  %837 = vmatprep.mubr.f32.mxu0 %v206_v9  ;;  %v320_v12 = vld [vmem:[#allocation5 + $0x80] sm:$0xff]  ;;  %v321_v13 = vld [vmem:[#allocation5 + $0x88] sm:$0xff]  ;;  %p1175_p4 = scmp.ne.s32.totalorder %s1478_s27, %s1174_s30  ;;  %s1250_s22 = smov [#allocation7]  }
  0x59   : > { %922 = vmatpush3.bf16.msra.mxu0 %v919_v3  ;;  %v322_v14 = vld [vmem:[#allocation5 + $0x90] sm:$0xff]  ;;  %v323_v15 = vld [vmem:[#allocation5 + $0x98] sm:$0xff]  ;;  %v951_v16 = vpack.c.bf16 %v321_v13, %v320_v12  ;;  %v931_v18 = vpack.c.bf16 %v217_v11, %v216_v10  ;;  %v324_v19 = vld [vmem:[#allocation5 + $0xa0] sm:$0xff]  ;;  %s1178_s7 = sshll.u32 %s1250_s22, 4  ;;  %s1179_s7 = int_to_ptr.vmem [resolvable:$false] %s1178_s7 }
  0x5a   : > { %924 = vmatprep.subr.bf16.mxu0 %v923_v5  ;;  %v955_v17 = vpack.c.bf16 %v323_v15, %v322_v14  ;;  %v325_v20 = vld [vmem:[#allocation5 + $0xa8] sm:$0xff]  ;;  %v218_v21 = vld [vmem:[#allocation5 + $0x40] sm:$0xff]  ;;  %v326_v25 = vld [vmem:[#allocation5 + $0xb0] sm:$0xff]  ;;  %p1176_p6 = pnand %p1175_p4, %p1367_p12  ;;  %s1180_s10 = scalar_lea.vmem %s1179_s7, 1024 }
  0x5b   : > { %v219_v22 = vld [vmem:[#allocation5 + $0x48] sm:$0xff]  ;;  %952 = vmatprep.subr.bf16.mxu1 %v951_v16  ;;  %v959_v23 = vpack.c.bf16 %v325_v20, %v324_v19  ;;  %v327_v26 = vld [vmem:[#allocation5 + $0xb8] sm:$0xff]  ;;  %v220_v27 = vld [vmem:[#allocation5 + $0x50] sm:$0xff]  ;;  %p1181_p10 = scmp.lt.s32.totalorder %s1478_s27, %s1179_s7  ;;  %p1182_p13 = scmp.lt.s32.totalorder %s1180_s10, %s1174_s30 }
  0x5c   : > { %954 = vmatpush3.bf16.msra.mxu1 %v951_v16  ;;  %v935_v24 = vpack.c.bf16 %v219_v22, %v218_v21  ;;  %v221_v28 = vld [vmem:[#allocation5 + $0x58] sm:$0xff]  ;;  %v963_v29 = vpack.c.bf16 %v327_v26, %v326_v25  ;;  %v328_v31 = vld [vmem:[#allocation5 + $0xc0] sm:$0xff]  ;;  %v329_v32 = vld [vmem:[#allocation5 + $0xc8] sm:$0xff]  ;;  %p1177_p8 = pneg %p1176_p6 }
  0x5d   : > { %926 = vmatpush3.bf16.msra.mxu0 %v923_v5  ;;  %956 = vmatprep.subr.bf16.mxu1 %v955_v17  ;;  %v939_v30 = vpack.c.bf16 %v221_v28, %v220_v27  ;;  %v222_v33 = vld [vmem:[#allocation5 + $0x60] sm:$0xff]  ;;  %v223_v34 = vld [vmem:[#allocation5 + $0x68] sm:$0xff]  ;;  %v967_v35 = vpack.c.bf16 %v329_v32, %v328_v31  ;;  %v330_v37 = vld [vmem:[#allocation5 + $0xd0] sm:$0xff]  ;;  %p1183_p3 = por %p1182_p13, %p1181_p10 }
  0x5e   : > { %928 = vmatprep.subr.bf16.mxu0 %v927_v8  ;;  %v943_v36 = vpack.c.bf16 %v223_v34, %v222_v33  ;;  %v331_v38 = vld [vmem:[#allocation5 + $0xd8] sm:$0xff]  ;;  %v224_v39 = vld [vmem:[#allocation5 + $0x70] sm:$0xff]  ;;  %v332_v43 = vld [vmem:[#allocation5 + $0xe0] sm:$0xff] }
  0x5f   : > { %v225_v40 = vld [vmem:[#allocation5 + $0x78] sm:$0xff]  ;;  %v971_v41 = vpack.c.bf16 %v331_v38, %v330_v37  ;;  %v333_v44 = vld [vmem:[#allocation5 + $0xe8] sm:$0xff]  ;;  %v208_v47 = vld [vmem:[%s1424_s26 + $0x10] sm:$0xff]  ;;  %p1184_p7 = pnand %p1183_p3, %p1177_p8 }
  0x60   : > { %958 = vmatpush3.bf16.msra.mxu1 %v955_v17  ;;  %v947_v42 = vpack.c.bf16 %v225_v40, %v224_v39  ;;  %v975_v45 = vpack.c.bf16 %v333_v44, %v332_v43  ;;  %v207_v46 = vld [vmem:[%s1424_s26 + $0x8] sm:$0xff]  ;;  %v209_v48 = vld [vmem:[%s1424_s26 + $0x18] sm:$0xff]  ;;  %v334_v49 = vld [vmem:[#allocation5 + $0xf0] sm:$0xff] }
  0x61   : > { %930 = vmatpush3.bf16.msra.mxu0 %v927_v8  ;;  %960 = vmatprep.subr.bf16.mxu1 %v959_v23  ;;  %v335_v50 = vld [vmem:[#allocation5 + $0xf8] sm:$0xff]  ;;  %v430_v52 = vld [vmem:[#allocation5 + $0x100] sm:$0xff]  ;;  %v431_v53 = vld [vmem:[#allocation5 + $0x108] sm:$0xff] }
  0x62   : > { %932 = vmatprep.subr.bf16.mxu0 %v931_v18  ;;  %v979_v51 = vpack.c.bf16 %v335_v50, %v334_v49  ;;  %v432_v54 = vld [vmem:[#allocation5 + $0x110] sm:$0xff]  ;;  %v983_v55 = vpack.c.bf16 %v431_v53, %v430_v52  ;;  %v433_v56 = vld [vmem:[#allocation5 + $0x118] sm:$0xff]  ;;  %v434_v58 = vld [vmem:[#allocation5 + $0x120] sm:$0xff] }
  0x63   : > { %v987_v57 = vpack.c.bf16 %v433_v56, %v432_v54  ;;  %v435_v59 = vld [vmem:[#allocation5 + $0x128] sm:$0xff]  ;;  %v436_v61 = vld [vmem:[#allocation5 + $0x130] sm:$0xff]  ;;  %v437_v62 = vld [vmem:[#allocation5 + $0x138] sm:$0xff] }
  0x64   : > { %962 = vmatpush3.bf16.msra.mxu1 %v959_v23  ;;  %v991_v60 = vpack.c.bf16 %v435_v59, %v434_v58  ;;  %v995_v63 = vpack.c.bf16 %v437_v62, %v436_v61  ;;  %v438_v0 = vld [vmem:[#allocation5 + $0x140] sm:$0xff]  ;;  %v439_v1 = vld [vmem:[#allocation5 + $0x148] sm:$0xff]  ;;  %v440_v3 = vld [vmem:[#allocation5 + $0x150] sm:$0xff] }
  0x65   : > { %934 = vmatpush3.bf16.msra.mxu0 %v931_v18  ;;  %964 = vmatprep.subr.bf16.mxu1 %v963_v29  ;;  %v999_v2 = vpack.c.bf16 %v439_v1, %v438_v0  ;;  %v441_v4 = vld [vmem:[#allocation5 + $0x158] sm:$0xff]  ;;  %v442_v6 = vld [vmem:[#allocation5 + $0x160] sm:$0xff]  ;;  %v443_v7 = vld [vmem:[#allocation5 + $0x168] sm:$0xff] }
  0x66   : > { %936 = vmatprep.subr.bf16.mxu0 %v935_v24  ;;  %v1003_v5 = vpack.c.bf16 %v441_v4, %v440_v3  ;;  %v1007_v8 = vpack.c.bf16 %v443_v7, %v442_v6  ;;  %v735_v9 = vld [vmem:[%s1528_s2] ss:$0 sm:$0xff]  ;;  %v444_v22 = vld [vmem:[#allocation5 + $0x170] sm:$0xff]  ;;  %v445_v23 = vld [vmem:[#allocation5 + $0x178] sm:$0xff]  ;;  %v536_v7 = vlaneseq }
  0x67   : > { %v736_v25 = vld [vmem:[%s1528_s2 + $0x1] ss:$0 sm:$0xff]  ;;  %v737_v38 = vld [vmem:[%s1528_s2 + $0x2] ss:$0 sm:$0xff] }
  0x68   : > { %966 = vmatpush3.bf16.msra.mxu1 %v963_v29 }
  0x69   : > { %938 = vmatpush3.bf16.msra.mxu0 %v935_v24  ;;  %968 = vmatprep.subr.bf16.mxu1 %v967_v35  ;;  %v1011_v24 = vpack.c.bf16 %v445_v23, %v444_v22 }
  0x6a   : > { %940 = vmatprep.subr.bf16.mxu0 %v939_v30 }
  0x6c   : > { %970 = vmatpush3.bf16.msra.mxu1 %v967_v35 }
  0x6d   : > { %942 = vmatpush3.bf16.msra.mxu0 %v939_v30  ;;  %972 = vmatprep.subr.bf16.mxu1 %v971_v41 }
  0x6e   : > { %944 = vmatprep.subr.bf16.mxu0 %v943_v36 }
  0x70   : > { %974 = vmatpush3.bf16.msra.mxu1 %v971_v41 }
  0x71   : > { %946 = vmatpush3.bf16.msra.mxu0 %v943_v36  ;;  %976 = vmatprep.subr.bf16.mxu1 %v975_v45 }
  0x72   : > { %948 = vmatprep.subr.bf16.mxu0 %v947_v42 }
  0x74   : > { %978 = vmatpush3.bf16.msra.mxu1 %v975_v45 }
  0x75   : > { %950 = vmatpush3.bf16.msra.mxu0 %v947_v42  ;;  %980 = vmatprep.subr.bf16.mxu1 %v979_v51 }
  0x76   : > { %984 = vmatprep.subr.bf16.mxu0 %v983_v55 }
  0x78   : > { %838 = vmatmul.mubr.f32.vlgmr.msra.gmra.mrb[0].mxu0 %v207_v46  ;;  %982 = vmatpush3.bf16.msra.mxu1 %v979_v51 }
  0x79   : > { %840 = vmatprep.mubr.f32.mxu0 %v208_v47  ;;  %1015 = vmatprep.subr.bf16.mxu1 %v983_v55 }
  0x7a   : > { %986 = vmatpush3.bf16.msra.mxu0 %v983_v55 }
  0x7b   : > { %988 = vmatprep.subr.bf16.mxu0 %v987_v57 }
  0x7c   : > { %841 = vmatmul.mubr.f32.gmra.mrb[2].mxu0 %v209_v48 }
  0x7e   : > { %990 = vmatpush3.bf16.msra.mxu0 %v987_v57 }
  0x7f   : > { %992 = vmatprep.subr.bf16.mxu0 %v991_v60 }
  0x82   : > { %994 = vmatpush3.bf16.msra.mxu0 %v991_v60 }
  0x83   : > { %996 = vmatprep.subr.bf16.mxu0 %v995_v63 }
  0x86   : > { %998 = vmatpush3.bf16.msra.mxu0 %v995_v63 }
  0x87   : > { %1000 = vmatprep.subr.bf16.mxu0 %v999_v2 }
  0x8a   : > { %1002 = vmatpush3.bf16.msra.mxu0 %v999_v2 }
  0x8b   : > { %1004 = vmatprep.subr.bf16.mxu0 %v1003_v5 }
  0x8e   : > { %1006 = vmatpush3.bf16.msra.mxu0 %v1003_v5 }
  0x8f   : > { %1008 = vmatprep.subr.bf16.mxu0 %v1007_v8 }
  0x92   : > { %1010 = vmatpush3.bf16.msra.mxu0 %v1007_v8 }
  0x93   : > { %1012 = vmatprep.subr.bf16.mxu0 %v1011_v24 }
  0x96   : > { %1014 = vmatpush3.bf16.msra.mxu0 %v1011_v24 }
 0x14b   : > { %v839_v10 = vpop.f32.mrb[0].mxu0 }
 0x14c   : > { %v303_v11 = vadd.f32 %v839_v10, %v735_v9  ;;  %v297_v12 = vpop.f32.mrb[1].mxu0 }
 0x14d   : > { %v298_v13 = vadd.f32 %v735_v9, %v297_v12 }
 0x14e   : > { %v317_v16 = vmax.f32 %v303_v11, 0.0 }
 0x14f   : > { %v842_v14 = vpop.f32.mrb[2].mxu0  ;;  %v316_v15 = vmax.f32 %v298_v13, 0.0 }
 0x150   : > { %v313_v17 = vadd.f32 %v842_v14, %v735_v9  ;;  %v307_v18 = vpop.f32.mrb[3].mxu0  ;;  %v1459_v14 = vand.u32 127, %v536_v7 }
 0x151   : > { %v308_v19 = vadd.f32 %v735_v9, %v307_v18  ;;  %875 = vmatprep.mubr.f32.mxu1 %v316_v15 }
 0x152   : > { %876 = vmatmul.mubr.f32.vlgmr.msra.gmra.mrb[0].mxu1 %v317_v16  ;;  %v319_v21 = vmax.f32 %v313_v17, 0.0  ;;  %vm618_vm0 = vcmp.lt.s32.totalorder %v1459_v14, 8 }
 0x153   : > { %v318_v20 = vmax.f32 %v308_v19, 0.0  ;;  %1023 = vmatpush3.bf16.msra.mxu1 %v983_v55 }
 0x154   : > { %1016 = vmatprep.subr.bf16.mxu1 %v987_v57 }
 0x155   : > { %878 = vmatprep.mubr.f32.mxu1 %v318_v20 }
 0x156   : > { %879 = vmatmul.mubr.f32.gmra.mrb[2].mxu1 %v319_v21 }
 0x157   : > { %1024 = vmatpush3.bf16.msra.mxu1 %v987_v57 }
 0x158   : > { %1017 = vmatprep.subr.bf16.mxu1 %v991_v60 }
 0x15b   : > { %1025 = vmatpush3.bf16.msra.mxu1 %v991_v60 }
 0x15c   : > { %1018 = vmatprep.subr.bf16.mxu1 %v995_v63 }
 0x15f   : > { %1026 = vmatpush3.bf16.msra.mxu1 %v995_v63 }
 0x160   : > { %1019 = vmatprep.subr.bf16.mxu1 %v999_v2 }
 0x163   : > { %1027 = vmatpush3.bf16.msra.mxu1 %v999_v2 }
 0x164   : > { %1020 = vmatprep.subr.bf16.mxu1 %v1003_v5 }
 0x167   : > { %1028 = vmatpush3.bf16.msra.mxu1 %v1003_v5 }
 0x168   : > { %1021 = vmatprep.subr.bf16.mxu1 %v1007_v8 }
 0x16b   : > { %1029 = vmatpush3.bf16.msra.mxu1 %v1007_v8 }
 0x16c   : > { %1022 = vmatprep.subr.bf16.mxu1 %v1011_v24 }
 0x16f   : > { %1030 = vmatpush3.bf16.msra.mxu1 %v1011_v24 }
 0x225   : > { %v877_v26 = vpop.f32.mrb[0].mxu1 }
 0x226   : > { %v413_v27 = vadd.f32 %v877_v26, %v736_v25  ;;  %v407_v28 = vpop.f32.mrb[1].mxu1 }
 0x227   : > { %v408_v29 = vadd.f32 %v736_v25, %v407_v28 }
 0x228   : > { %v427_v32 = vmax.f32 %v413_v27, 0.0 }
 0x229   : > { %v426_v30 = vmax.f32 %v408_v29, 0.0  ;;  %v880_v31 = vpop.f32.mrb[2].mxu1 }
 0x22a   : > { %v423_v33 = vadd.f32 %v880_v31, %v736_v25  ;;  %v417_v34 = vpop.f32.mrb[3].mxu1 }
 0x22b   : > { %v418_v35 = vadd.f32 %v736_v25, %v417_v34  ;;  %913 = vmatprep.mubr.f32.mxu0 %v426_v30 }
 0x22c   : > { %914 = vmatmul.mubr.f32.vlgmr.msra.gmra.mrb[4].mxu0 %v427_v32  ;;  %v429_v37 = vmax.f32 %v423_v33, 0.0 }
 0x22d   : > { %v428_v36 = vmax.f32 %v418_v35, 0.0 }
 0x22f   : > { %916 = vmatprep.mubr.f32.mxu1 %v428_v36 }
 0x230   : > { %917 = vmatmul.mubr.f32.vlgmr.msra.gmra.mrb[4].mxu1 %v429_v37 }
 0x2ff   : > { %v915_v39 = vpop.f32.mrb[4].mxu0 }
 0x300   : > { %v523_v40 = vadd.f32 %v915_v39, %v737_v38  ;;  %v517_v41 = vpop.f32.mrb[5].mxu0 }
 0x301   : > { %v518_v42 = vadd.f32 %v737_v38, %v517_v41 }
 0x302   : > { %v1447_v43 = vadd.f32 4.9932394, %v523_v40  ;;  %v539_v1 = vmul.f32 0.2, %v523_v40 }
 0x303   : > { %v1449_v44 = vadd.f32 4.9932394, %v518_v42  ;;  %v918_v45 = vpop.f32.mrb[4].mxu1  ;;  %v538_v3 = vmul.f32 0.2, %v518_v42 }
 0x304   : > { %v559_v46 = vand.u32 2147483647, %v1447_v43  ;;  %v533_v47 = vadd.f32 %v918_v45, %v737_v38  ;;  %v527_v48 = vpop.f32.mrb[5].mxu1  ;;  %v555_v22 = vmax.f32 %v1447_v43, 0.0 }
 0x305   : > { %v558_v49 = vand.u32 2147483647, %v1449_v44  ;;  %v528_v50 = vadd.f32 %v737_v38, %v527_v48  ;;  %v554_v34 = vmax.f32 %v1449_v44, 0.0 }
 0x306   : > { %v563_v51 = vsub.f32 0.0, %v559_v46  ;;  %v1453_v52 = vadd.f32 4.9932394, %v533_v47  ;;  %v541_v10 = vmul.f32 0.2, %v533_v47 }
 0x307   : > { %v562_v53 = vsub.f32 0.0, %v558_v49  ;;  %v1455_v54 = vadd.f32 4.9932394, %v528_v50  ;;  %v540_v13 = vmul.f32 0.2, %v528_v50 }
 0x308   : > { %v568_v55 = vmul.f32 1.442695, %v563_v51  ;;  %v561_v56 = vand.u32 2147483647, %v1453_v52  ;;  %v557_v39 = vmax.f32 %v1453_v52, 0.0 }
 0x309   : > { %v566_v57 = vmul.f32 1.442695, %v562_v53  ;;  %v560_v58 = vand.u32 2147483647, %v1455_v54  ;;  %v556_v40 = vmax.f32 %v1455_v54, 0.0 }
 0x30a   : > { %1092 = vpow2.f32 %v568_v55  ;;  %v565_v59 = vsub.f32 0.0, %v561_v56 }
 0x30b   : > { %1094 = vpow2.f32 %v566_v57  ;;  %v564_v60 = vsub.f32 0.0, %v560_v58 }
 0x30c   : > { %v572_v61 = vmul.f32 1.442695, %v565_v59 }
 0x30d   : > { %v570_v62 = vmul.f32 1.442695, %v564_v60 }
 0x30e   : > { %1096 = vpow2.f32 %v572_v61 }
 0x30f   : > { %1098 = vpow2.f32 %v570_v62 }
 0x314   : > { %v1093_v63 = vpop.eup %1092 }
 0x315   : > { %v1095_v0 = vpop.eup %1094  ;;  %v583_v2 = vadd.f32 1.0, %v1093_v63  ;;  %v586_v9 = vmul.f32 -0.5, %v1093_v63  ;;  %v589_v16 = vand.u32 2147483647, %v1093_v63 }
 0x316   : > { %v574_v4 = vadd.f32 1.0, %v1095_v0  ;;  %v577_v12 = vmul.f32 -0.5, %v1095_v0  ;;  %v580_v20 = vand.u32 2147483647, %v1095_v0 }
 0x317   : > { %1100 = vlog2.f32 %v583_v2  ;;  %v587_v15 = vadd.f32 1.0, %v586_v9  ;;  %vm590_vm1 = vcmp.lt.f32.partialorder %v589_v16, 0.0004427343 }
 0x318   : > { %v1097_v5 = vpop.eup %1096  ;;  %1102 = vlog2.f32 %v574_v4  ;;  %v578_v18 = vadd.f32 1.0, %v577_v12  ;;  %vm581_vm2 = vcmp.lt.f32.partialorder %v580_v20, 0.0004427343 }
 0x319   : > { %v1099_v6 = vpop.eup %1098  ;;  %1104 = vtanh.f32 %v539_v1  ;;  %v601_v8 = vadd.f32 1.0, %v1097_v5  ;;  %v604_v17 = vmul.f32 -0.5, %v1097_v5  ;;  %v588_v25 = vmul.f32 %v1093_v63, %v587_v15 }
 0x31a   : > { %1106 = vtanh.f32 %v538_v3  ;;  %v592_v11 = vadd.f32 1.0, %v1099_v6  ;;  %v595_v19 = vmul.f32 -0.5, %v1099_v6  ;;  %v579_v29 = vmul.f32 %v1095_v0, %v578_v18 }
 0x31b   : > { %1108 = vlog2.f32 %v601_v8  ;;  %v605_v26 = vadd.f32 1.0, %v604_v17  ;;  %v607_v30 = vand.u32 2147483647, %v1097_v5  ;;  %v598_v35 = vand.u32 2147483647, %v1099_v6 }
 0x31c   : > { %1110 = vlog2.f32 %v592_v11  ;;  %v596_v31 = vadd.f32 1.0, %v595_v19 }
 0x31d   : > { %1112 = vtanh.f32 %v541_v10  ;;  %v606_v46 = vmul.f32 %v1097_v5, %v605_v26  ;;  %vm608_vm3 = vcmp.lt.f32.partialorder %v607_v30, 0.0004427343  ;;  %vm599_vm4 = vcmp.lt.f32.partialorder %v598_v35, 0.0004427343 }
 0x31e   : > { %1114 = vtanh.f32 %v540_v13  ;;  %v597_v44 = vmul.f32 %v1099_v6, %v596_v31 }
 0x321   : > { %v1101_v21 = vpop.eup %1100 }
 0x322   : > { %v1103_v23 = vpop.eup %1102  ;;  %v585_v24 = vmul.f32 0.6931472, %v1101_v21 }
 0x323   : > { %v1105_v27 = vpop.eup %1104  ;;  %v576_v28 = vmul.f32 0.6931472, %v1103_v23 }
 0x324   : > { %v1107_v32 = vpop.eup %1106  ;;  %v591_v33 = vsel %vm590_vm1, %v588_v25, %v585_v24  ;;  %v547_v42 = vmul.f32 5.0, %v1105_v27 }
 0x325   : > { %v1109_v36 = vpop.eup %1108  ;;  %v611_v37 = vadd.f32 %v591_v33, %v555_v22  ;;  %v582_v38 = vsel %vm581_vm2, %v579_v29, %v576_v28  ;;  %v546_v50 = vmul.f32 5.0, %v1107_v32 }
 0x326   : > { %v1111_v41 = vpop.eup %1110  ;;  %v610_v43 = vadd.f32 %v582_v38, %v554_v34  ;;  %v603_v45 = vmul.f32 0.6931472, %v1109_v36 }
 0x327   : > { %v615_v47 = vadd.f32 0.0001, %v611_v37  ;;  %v594_v48 = vmul.f32 0.6931472, %v1111_v41  ;;  %v1113_v49 = vpop.eup %1112 }
 0x328   : > { %v614_v51 = vadd.f32 0.0001, %v610_v43  ;;  %v609_v53 = vsel %vm608_vm3, %v606_v46, %v603_v45  ;;  %v1115_v55 = vpop.eup %1114  ;;  %v549_v59 = vmul.f32 5.0, %v1113_v49 }
 0x329   : > { %v620_v52 = vsel %vm618_vm0, %v547_v42, %v615_v47  ;;  %v613_v54 = vadd.f32 %v609_v53, %v557_v39  ;;  %v600_v56 = vsel %vm599_vm4, %v597_v44, %v594_v48  ;;  %v548_v61 = vmul.f32 5.0, %v1115_v55 }
 0x32a   : > { %624 = vst [vmem:[%s203_s11 + $0x8] sm:$0xff] %v620_v52  ;;  %v619_v57 = vsel %vm618_vm0, %v546_v50, %v614_v51  ;;  %v612_v58 = vadd.f32 %v600_v56, %v556_v40 }
 0x32b   : > { %623 = vst [vmem:[%s203_s11] sm:$0xff] %v619_v57  ;;  %v617_v60 = vadd.f32 0.0001, %v613_v54 }
 0x32c   : > { %v616_v62 = vadd.f32 0.0001, %v612_v58 }
 0x32d   : > { %v622_v63 = vsel %vm618_vm0, %v549_v59, %v617_v60 }
 0x32e   : > { %626 = vst [vmem:[%s203_s11 + $0x18] sm:$0xff] %v622_v63  ;;  %v621_v0 = vsel %vm618_vm0, %v548_v61, %v616_v62 }
 0x32f   : > { %625 = vst [vmem:[%s203_s11 + $0x10] sm:$0xff] %v621_v0 }
 0x330   : > { %1187 = shalt.err (!%p1184_p7)
}
 0x331   : > { %s1188_s26 = scalar_lea.hbm %s1476_s29, 512  ;;  %s1192_s8 = scalar_lea.hbm %s1529_s3, 1024 }
 0x332   : > { %p1189_p9 = scmp.ne.s32.totalorder %s1476_s29, %s1188_s26  ;;  %p1193_p5 = scmp.lt.u32.totalorder %s1476_s29, %s1529_s3 }
 0x333   : > { %p1194_p11 = scmp.lt.u32.totalorder %s1192_s8, %s1188_s26  ;;  %p1196_p4 = scmp.lt.u32.totalorder %s1188_s26, %s1476_s29 }
 0x334   : > { %p1190_p1 = pnand %p1189_p9, %p1367_p12 }
 0x335   : > { %p1195_p2 = por %p1194_p11, %p1193_p5 }
 0x336   : > { %p1191_p0 = pneg %p1190_p1 }
 0x337   : > { %p1197_p6 = por %p1196_p4, %p1195_p2 }
 0x339   : > { %p1198_p8 = pnand %p1197_p6, %p1191_p0 }
 0x33b   : > { %1201 = shalt.err (!%p1198_p8)
}
 0x33c   : > { %s1251_s25 = smov 128   ;;  %s1252_s5 = smov 8  }
 0x33d   : > { %1037 = dma.vmem_to_hbm [thread:$0]  (%p1367_p12), %s1478_s27, 512, %s1476_s29, %s628_s16, %s1251_s25, %s1251_s25, %s1252_s5  }
 0x33e PF: > { %s656_s11 = sand.u32 1, %s1232_s12   ;;  %p1544_p10 = scmp.ne.s32.totalorder %s1534_s19, 0 }
 0x33f   : > { %p1545_p13 = scmp.ge.s32.totalorder %s1244_s15, 2  ;;  %s657_s28 = scalar_lea.sflag [#allocation4], %s656_s11 }
 0x341   : > { %p1048_p3 = pnand %p1545_p13, %p1544_p10 }
 0x343   : > { %1227 = dma.done.wait (!%p1048_p3), %s657_s28, 512  }
 0x344   : > { %1229 = vsyncadd (!%p1048_p3), %s657_s28, 4294966784  ;;  %p17_p7 = scmp.ge.s32.totalorder %s1329_s24, 4   ;;  %s1546_s12 = smov %s1236_s13 }
 0x345   : > { %s1547_s13 = smov %s1240_s14  ;;  %s1548_s14 = smov %s1363_s17 }
 0x346   : > { %s1549_s15 = smov %s1329_s24  ;;  %19 = sbr.rel (!%p17_p7) target bundleno = 6 (0x6), region = 81 }
 0x34d   :  { %662 = vsyncpa [#allocation3], 1 }
 0x34e   :  { %664 = vsyncpa [#allocation3 + $0x1], 1 }
 0x34f   :  { %665 = vsyncpa [#allocation6], 1 }
 0x350   :  { %666 = vsyncpa [#allocation4], 1 }
 0x351   :  { %668 = vsyncpa [#allocation4 + $0x1], 1 }

</bundles_post_ra>
